<compile_context>
chip_gen: v7x
topology: tpu7x:2x2x1
jax: 0.10.0
libtpu: 0.0.40
codegen_flags: <defaults>
</compile_context>

<pallas_src>
import functools

import jax
import jax.numpy as jnp
from jax.experimental import pallas as pl
from jax.experimental.pallas import tpu as pltpu


def _round_up(x: int, m: int) -> int:
    return (x + m - 1) // m * m


def generator_kernel(x_ref, w1_ref, b1_ref, w2_ref, b2_ref, w3_ref, b3_ref,
                     o_ref):
    # fc1 + relu  (bf16 operands on the MXU, f32 accumulate, f32 epilogue)
    h = jnp.dot(x_ref[...], w1_ref[...], preferred_element_type=jnp.float32)
    h = jnp.maximum(h + b1_ref[...], 0.0)
    # fc2 + relu
    h = jnp.dot(h.astype(jnp.bfloat16), w2_ref[...],
                preferred_element_type=jnp.float32)
    h = jnp.maximum(h + b2_ref[...], 0.0)
    # fc3 (no activation)
    h = jnp.dot(h.astype(jnp.bfloat16), w3_ref[...],
                preferred_element_type=jnp.float32)
    o_ref[...] = (h + b3_ref[...]).astype(o_ref.dtype)


@functools.partial(jax.jit, static_argnames=("block_batch",))
def generator_forward(x, params, *, block_batch=256):
    """x: (B, input_dim) f32. params: w1,b1,w2,b2,w3,b3 with weights (in, out)."""
    w1, b1, w2, b2, w3, b3 = (params["w1"], params["b1"], params["w2"],
                              params["b2"], params["w3"], params["b3"])
    B, in_dim = x.shape
    hid_dim = w1.shape[1]
    out_dim = w3.shape[1]

    # Lane-dense padded feature dims (multiples of 128).
    in_p = _round_up(in_dim, 128)
    hid_p = _round_up(hid_dim, 128)
    out_p = _round_up(out_dim, 128)

    # Batch tile: multiple of 8 (sublane), capped at block_batch; pad B up so
    # the grid divides evenly (padded rows are zeros and sliced off below).
    tb = min(block_batch, _round_up(B, 8))
    b_p = _round_up(B, tb)
    grid = (b_p // tb,)

    def pad2(a, rows, cols, dtype):
        a = a.astype(dtype)
        return jnp.pad(a, ((0, rows - a.shape[0]), (0, cols - a.shape[1])))

    bf16, f32 = jnp.bfloat16, jnp.float32
    xp = pad2(x, b_p, in_p, bf16)
    w1p = pad2(w1, in_p, hid_p, bf16)
    w2p = pad2(w2, hid_p, hid_p, bf16)
    w3p = pad2(w3, hid_p, out_p, bf16)
    b1p = pad2(b1, 1, hid_p, f32)
    b2p = pad2(b2, 1, hid_p, f32)
    b3p = pad2(b3, 1, out_p, f32)

    # VMEM budget: double-buffered x / out tiles + VMEM-resident weights and
    # biases + f32 activation intermediates (with headroom); clamp to 64 MiB
    # so it is safe on v7x (64 MiB physical VMEM per TC).
    need = (2 * tb * in_p * 2 + 2 * tb * out_p * 4              # x / out tiles (x2 buffers)
            + 2 * 2 * (in_p * hid_p + hid_p * hid_p + hid_p * out_p)  # bf16 weights
            + 2 * 4 * (2 * hid_p + out_p)                       # f32 biases
            + 4 * tb * hid_p * 4)                               # activation headroom
    vmem_limit = int(min(max(need, 32 << 20), 64 << 20))

    flops = 2 * b_p * (in_p * hid_p + hid_p * hid_p + hid_p * out_p)
    bytes_accessed = (xp.size * 2 + w1p.size * 2 + w2p.size * 2 + w3p.size * 2
                      + (b1p.size + b2p.size + b3p.size) * 4 + b_p * out_p * 4)

    resident = lambda i: (0, 0)   # weights / biases: same block every step
    out_full = pl.pallas_call(
        generator_kernel,
        out_shape=jax.ShapeDtypeStruct((b_p, out_p), jnp.float32),
        grid=grid,
        in_specs=[
            pl.BlockSpec((tb, in_p), lambda i: (i, 0)),
            pl.BlockSpec((in_p, hid_p), resident),
            pl.BlockSpec((1, hid_p), resident),
            pl.BlockSpec((hid_p, hid_p), resident),
            pl.BlockSpec((1, hid_p), resident),
            pl.BlockSpec((hid_p, out_p), resident),
            pl.BlockSpec((1, out_p), resident),
        ],
        out_specs=pl.BlockSpec((tb, out_p), lambda i: (i, 0)),
        compiler_params=pltpu.CompilerParams(
            dimension_semantics=("parallel",),
            vmem_limit_bytes=vmem_limit),
        cost_estimate=pl.CostEstimate(flops=flops, transcendentals=0,
                                      bytes_accessed=bytes_accessed),
    )(xp, w1p, b1p, w2p, b2p, w3p, b3p)

    return out_full[:B, :out_dim]


def init_params(key, input_dim, hidden_dim, output_dim):
    """Deterministic synthetic init (PyTorch-like uniform fan-in scaling)."""
    ks = jax.random.split(key, 6)

    def lin(kw, kb, fan_in, fan_out):
        bound = 1.0 / jnp.sqrt(fan_in)
        # stored as (in, out) == W^T of PyTorch's (out, in)
        w = jax.random.uniform(kw, (fan_in, fan_out), jnp.float32, -bound, bound)
        b = jax.random.uniform(kb, (1, fan_out), jnp.float32, -bound, bound)
        return w, b

    w1, b1 = lin(ks[0], ks[1], input_dim, hidden_dim)
    w2, b2 = lin(ks[2], ks[3], hidden_dim, hidden_dim)
    w3, b3 = lin(ks[4], ks[5], hidden_dim, output_dim)
    return {"w1": w1, "b1": b1, "w2": w2, "b2": b2, "w3": w3, "b3": b3}


def reference_forward_f32(x, p):
    h = jnp.maximum(x @ p["w1"] + p["b1"], 0.0)
    h = jnp.maximum(h @ p["w2"] + p["b2"], 0.0)
    return h @ p["w3"] + p["b3"]


def reference_forward_bf16(x, p):
    """Matches the kernel's bf16-operand / f32-accumulate matmul semantics."""
    bf = jnp.bfloat16

    def mm(a, w):
        return jnp.dot(a.astype(bf), w.astype(bf),
                       preferred_element_type=jnp.float32)

    h = jnp.maximum(mm(x, p["w1"]) + p["b1"], 0.0)
    h = jnp.maximum(mm(h, p["w2"]) + p["b2"], 0.0)
    return mm(h, p["w3"]) + p["b3"]


if __name__ == "__main__":
    input_dim, hidden_dim, output_dim = 16, 32, 16
    batch = 8

    key = jax.random.PRNGKey(0)
    kx, kp = jax.random.split(key)
    x = jax.random.normal(kx, (batch, input_dim), jnp.float32)
    params = init_params(kp, input_dim, hidden_dim, output_dim)

    out = jax.block_until_ready(generator_forward(x, params))

    assert out.shape == (batch, output_dim)
    assert out.dtype == jnp.float32

    # Tight check vs a reference with matching bf16-matmul semantics.
    ref_bf16 = reference_forward_bf16(x, params)
    assert jnp.allclose(out, ref_bf16, atol=2e-3, rtol=2e-3), \
        "mismatch vs bf16-matched reference"

    # Looser check vs the full-f32 PyTorch-semantics reference.
    ref_f32 = reference_forward_f32(x, params)
    assert jnp.allclose(out, ref_f32, atol=5e-2, rtol=5e-2), \
        "mismatch vs f32 reference"

    print("KERNEL_OK")
</pallas_src>

<mosaic_0001>
module attributes {stable_mosaic.version = 11 : i64} {
  func.func @generator_kernel(%arg0: i32, %arg1: memref<8x128xbf16, #tpu.memory_space<vmem>>, %arg2: memref<128x128xbf16, #tpu.memory_space<vmem>>, %arg3: memref<1x128xf32, #tpu.memory_space<vmem>>, %arg4: memref<128x128xbf16, #tpu.memory_space<vmem>>, %arg5: memref<1x128xf32, #tpu.memory_space<vmem>>, %arg6: memref<128x128xbf16, #tpu.memory_space<vmem>>, %arg7: memref<1x128xf32, #tpu.memory_space<vmem>>, %arg8: memref<8x128xf32, #tpu.memory_space<vmem>>) attributes {dimension_semantics = [#tpu.dimension_semantics<parallel>], iteration_bounds = array<i64: 1>, scalar_prefetch = 0 : i64, scratch_operands = 0 : i64, tpu.core_type = #tpu.core_type<tc>, window_params = [{transform_indices = @transform_0, window_bounds = array<i64: 8, 128>}, {pipeline_mode = #tpu.pipeline_mode<synchronous>, transform_indices = @transform_1, window_bounds = array<i64: 128, 128>}, {pipeline_mode = #tpu.pipeline_mode<synchronous>, transform_indices = @transform_2, window_bounds = array<i64: 1, 128>}, {pipeline_mode = #tpu.pipeline_mode<synchronous>, transform_indices = @transform_3, window_bounds = array<i64: 128, 128>}, {pipeline_mode = #tpu.pipeline_mode<synchronous>, transform_indices = @transform_4, window_bounds = array<i64: 1, 128>}, {pipeline_mode = #tpu.pipeline_mode<synchronous>, transform_indices = @transform_5, window_bounds = array<i64: 128, 128>}, {pipeline_mode = #tpu.pipeline_mode<synchronous>, transform_indices = @transform_6, window_bounds = array<i64: 1, 128>}, {transform_indices = @transform_7, window_bounds = array<i64: 8, 128>}]} {
    %c0 = arith.constant 0 : index
    %c0_0 = arith.constant 0 : index
    %0 = vector.load %arg1[%c0, %c0_0] : memref<8x128xbf16, #tpu.memory_space<vmem>>, vector<8x128xbf16>
    %c0_1 = arith.constant 0 : index
    %c0_2 = arith.constant 0 : index
    %1 = vector.load %arg2[%c0_1, %c0_2] : memref<128x128xbf16, #tpu.memory_space<vmem>>, vector<128x128xbf16>
    %cst = arith.constant dense<0.000000e+00> : vector<8x128xf32>
    %2 = tpu.matmul %0, %1, %cst {dimension_numbers = #tpu.dot_dimension_numbers<[1], [0], [0], [1], [0, 0, 1, 1], [], []>} : vector<8x128xbf16>, vector<128x128xbf16>, vector<8x128xf32> -> vector<8x128xf32>
    %c0_3 = arith.constant 0 : index
    %c0_4 = arith.constant 0 : index
    %3 = vector.load %arg3[%c0_3, %c0_4] : memref<1x128xf32, #tpu.memory_space<vmem>>, vector<1x128xf32>
    %4 = vector.broadcast %3 : vector<1x128xf32> to vector<8x128xf32>
    %5 = arith.addf %2, %4 : vector<8x128xf32>
    %cst_5 = arith.constant 0.000000e+00 : f32
    %6 = vector.broadcast %cst_5 : f32 to vector<8x128xf32>
    %7 = arith.maximumf %5, %6 : vector<8x128xf32>
    %8 = arith.truncf %7 : vector<8x128xf32> to vector<8x128xbf16>
    %c0_6 = arith.constant 0 : index
    %c0_7 = arith.constant 0 : index
    %9 = vector.load %arg4[%c0_6, %c0_7] : memref<128x128xbf16, #tpu.memory_space<vmem>>, vector<128x128xbf16>
    %cst_8 = arith.constant dense<0.000000e+00> : vector<8x128xf32>
    %10 = tpu.matmul %8, %9, %cst_8 {dimension_numbers = #tpu.dot_dimension_numbers<[1], [0], [0], [1], [0, 0, 1, 1], [], []>} : vector<8x128xbf16>, vector<128x128xbf16>, vector<8x128xf32> -> vector<8x128xf32>
    %c0_9 = arith.constant 0 : index
    %c0_10 = arith.constant 0 : index
    %11 = vector.load %arg5[%c0_9, %c0_10] : memref<1x128xf32, #tpu.memory_space<vmem>>, vector<1x128xf32>
    %12 = vector.broadcast %11 : vector<1x128xf32> to vector<8x128xf32>
    %13 = arith.addf %10, %12 : vector<8x128xf32>
    %cst_11 = arith.constant 0.000000e+00 : f32
    %14 = vector.broadcast %cst_11 : f32 to vector<8x128xf32>
    %15 = arith.maximumf %13, %14 : vector<8x128xf32>
    %16 = arith.truncf %15 : vector<8x128xf32> to vector<8x128xbf16>
    %c0_12 = arith.constant 0 : index
    %c0_13 = arith.constant 0 : index
    %17 = vector.load %arg6[%c0_12, %c0_13] : memref<128x128xbf16, #tpu.memory_space<vmem>>, vector<128x128xbf16>
    %cst_14 = arith.constant dense<0.000000e+00> : vector<8x128xf32>
    %18 = tpu.matmul %16, %17, %cst_14 {dimension_numbers = #tpu.dot_dimension_numbers<[1], [0], [0], [1], [0, 0, 1, 1], [], []>} : vector<8x128xbf16>, vector<128x128xbf16>, vector<8x128xf32> -> vector<8x128xf32>
    %c0_15 = arith.constant 0 : index
    %c0_16 = arith.constant 0 : index
    %19 = vector.load %arg7[%c0_15, %c0_16] : memref<1x128xf32, #tpu.memory_space<vmem>>, vector<1x128xf32>
    %20 = vector.broadcast %19 : vector<1x128xf32> to vector<8x128xf32>
    %21 = arith.addf %18, %20 : vector<8x128xf32>
    %c0_17 = arith.constant 0 : index
    %c0_18 = arith.constant 0 : index
    %22 = vector.load %arg8[%c0_17, %c0_18] : memref<8x128xf32, #tpu.memory_space<vmem>>, vector<8x128xf32>
    tpu.vector_store %arg8[%c0_17, %c0_18], %21 {strides = array<i32>} : memref<8x128xf32, #tpu.memory_space<vmem>>, vector<8x128xf32>,
    return
  }
  func.func @transform_0(%arg0: i32) -> (i32, i32) {
    %c0_i32 = arith.constant 0 : i32
    %c0_i32_0 = arith.constant 0 : i32
    return %arg0, %c0_i32 : i32, i32
  }
  func.func @transform_1(%arg0: i32) -> (i32, i32) {
    %c0_i32 = arith.constant 0 : i32
    %c0_i32_0 = arith.constant 0 : i32
    %c0_i32_1 = arith.constant 0 : i32
    return %c0_i32, %c0_i32_0 : i32, i32
  }
  func.func @transform_2(%arg0: i32) -> (i32, i32) {
    %c0_i32 = arith.constant 0 : i32
    %c0_i32_0 = arith.constant 0 : i32
    %c0_i32_1 = arith.constant 0 : i32
    return %c0_i32, %c0_i32_0 : i32, i32
  }
  func.func @transform_3(%arg0: i32) -> (i32, i32) {
    %c0_i32 = arith.constant 0 : i32
    %c0_i32_0 = arith.constant 0 : i32
    %c0_i32_1 = arith.constant 0 : i32
    return %c0_i32, %c0_i32_0 : i32, i32
  }
  func.func @transform_4(%arg0: i32) -> (i32, i32) {
    %c0_i32 = arith.constant 0 : i32
    %c0_i32_0 = arith.constant 0 : i32
    %c0_i32_1 = arith.constant 0 : i32
    return %c0_i32, %c0_i32_0 : i32, i32
  }
  func.func @transform_5(%arg0: i32) -> (i32, i32) {
    %c0_i32 = arith.constant 0 : i32
    %c0_i32_0 = arith.constant 0 : i32
    %c0_i32_1 = arith.constant 0 : i32
    return %c0_i32, %c0_i32_0 : i32, i32
  }
  func.func @transform_6(%arg0: i32) -> (i32, i32) {
    %c0_i32 = arith.constant 0 : i32
    %c0_i32_0 = arith.constant 0 : i32
    %c0_i32_1 = arith.constant 0 : i32
    return %c0_i32, %c0_i32_0 : i32, i32
  }
  func.func @transform_7(%arg0: i32) -> (i32, i32) {
    %c0_i32 = arith.constant 0 : i32
    %c0_i32_0 = arith.constant 0 : i32
    return %arg0, %c0_i32 : i32, i32
  }
}

</mosaic_0001>

<bundles_post_ra>
// kernel: generator_forward.1
= control target key start
LH: loop header
LB: loop body
LE: loop exit
PB: predicated region body
PF: predicated region fallthrough
CT: control target
= control target key end

     0   :  { %v546_v1 = vmov 0.0   ;;  %vm547_vm0 = vmmov 0   ;;  %s715_s0 = inlined_call_operand.vmem [shape: bf16[8,128], index: 0, kind: input, shape index: {}]   ;;  %s716_s1 = inlined_call_operand.vmem [shape: bf16[128,128], index: 1, kind: input, shape index: {}]   ;;  %s717_s2 = inlined_call_operand.vmem [shape: f32[1,128], index: 2, kind: input, shape index: {}]   ;;  %s718_s3 = inlined_call_operand.vmem [shape: bf16[128,128], index: 3, kind: input, shape index: {}]   ;;  %s719_s4 = inlined_call_operand.vmem [shape: f32[1,128], index: 4, kind: input, shape index: {}]   ;;  %s720_s5 = inlined_call_operand.vmem [shape: bf16[128,128], index: 5, kind: input, shape index: {}]   ;;  %s721_s6 = inlined_call_operand.vmem [shape: f32[1,128], index: 6, kind: input, shape index: {}]   ;;  %s722_s7 = inlined_call_operand.hbm [shape: f32[8,128], index: 7, kind: output, shape index: {}]  }
   0x1   :  { %v498_v0 = vld [vmem:[%s716_s1] sm:$0xff]   ;;  %435 = vmatprep.subr.bf16.mxu0 %v546_v1  ;;  %455 = vmatprep.subr.bf16.mxu1 %v546_v1  ;;  %v499_v2 = vld [vmem:[%s716_s1 + $0x8] sm:$0xff]   ;;  %v500_v3 = vld [vmem:[%s716_s1 + $0x10] sm:$0xff]  }
   0x2   :  { %436 = vmatpush3.bf16.msra.mxu0 %v498_v0  ;;  %451 = vmatprep.mubr.msk.bf16.mxu0 %vm547_vm0, %v546_v1  ;;  %v506_v4 = vld [vmem:[%s718_s3] sm:$0xff]   ;;  %v501_v5 = vld [vmem:[%s716_s1 + $0x18] sm:$0xff]   ;;  %v507_v6 = vld [vmem:[%s718_s3 + $0x8] sm:$0xff]  }
   0x3   :  { %437 = vmatprep.subr.bf16.mxu0 %v546_v1  ;;  %471 = vmatprep.mubr.msk.bf16.mxu1 %vm547_vm0, %v546_v1  ;;  %v502_v7 = vld [vmem:[%s716_s1 + $0x20] sm:$0xff]   ;;  %v508_v8 = vld [vmem:[%s718_s3 + $0x10] sm:$0xff]   ;;  %v503_v9 = vld [vmem:[%s716_s1 + $0x28] sm:$0xff]  }
   0x4   :  { %456 = vmatpush3.bf16.msra.mxu1 %v506_v4  ;;  %v509_v10 = vld [vmem:[%s718_s3 + $0x18] sm:$0xff]  }
   0x5   :  { %457 = vmatprep.subr.bf16.mxu1 %v546_v1 }
   0x6   :  { %438 = vmatpush3.bf16.msra.mxu0 %v499_v2 }
   0x7   :  { %439 = vmatprep.subr.bf16.mxu0 %v546_v1 }
   0x8   :  { %458 = vmatpush3.bf16.msra.mxu1 %v507_v6 }
   0x9   :  { %459 = vmatprep.subr.bf16.mxu1 %v546_v1 }
   0xa   :  { %440 = vmatpush3.bf16.msra.mxu0 %v500_v3 }
   0xb   :  { %441 = vmatprep.subr.bf16.mxu0 %v546_v1 }
   0xc   :  { %460 = vmatpush3.bf16.msra.mxu1 %v508_v8 }
   0xd   :  { %461 = vmatprep.subr.bf16.mxu1 %v546_v1 }
   0xe   :  { %442 = vmatpush3.bf16.msra.mxu0 %v501_v5 }
   0xf   :  { %443 = vmatprep.subr.bf16.mxu0 %v546_v1 }
  0x12   :  { %444 = vmatpush3.bf16.msra.mxu0 %v502_v7 }
  0x13   :  { %445 = vmatprep.subr.bf16.mxu0 %v546_v1 }
  0x14   :  { %12 = vsyncpa [#allocation3], 0  ;;  %v504_v11 = vld [vmem:[%s716_s1 + $0x30] sm:$0xff]   ;;  %462 = vmatpush3.bf16.msra.mxu1 %v509_v10  ;;  %v510_v12 = vld [vmem:[%s718_s3 + $0x20] sm:$0xff]   ;;  %s548_s30 = smov [#allocation2]  }
  0x15   :  { %463 = vmatprep.subr.bf16.mxu1 %v546_v1  ;;  %v505_v13 = vld [vmem:[%s716_s1 + $0x38] sm:$0xff]   ;;  %v511_v14 = vld [vmem:[%s718_s3 + $0x28] sm:$0xff]   ;;  %v28_v15 = vld [vmem:[%s715_s0] sm:$0xf]  ;;  %s373_s1 = sshll.u32 %s548_s30, 4  ;;  %s374_s1 = int_to_ptr.vmem [resolvable:$true] %s373_s1 }
  0x16   :  { %446 = vmatpush3.bf16.msra.mxu0 %v503_v9  ;;  %v512_v16 = vld [vmem:[%s718_s3 + $0x30] sm:$0xff]   ;;  %v513_v17 = vld [vmem:[%s718_s3 + $0x38] sm:$0xff]   ;;  %v514_v18 = vld [vmem:[%s720_s5] sm:$0xff]   ;;  %p527_p1 = scmp.lt.s32.totalorder %s374_s1, %s374_s1 }
  0x17   :  { %447 = vmatprep.subr.bf16.mxu0 %v546_v1  ;;  %v515_v19 = vld [vmem:[%s720_s5 + $0x8] sm:$0xff]   ;;  %v516_v20 = vld [vmem:[%s720_s5 + $0x10] sm:$0xff]   ;;  %v517_v21 = vld [vmem:[%s720_s5 + $0x18] sm:$0xff]  }
  0x18   :  { %464 = vmatpush3.bf16.msra.mxu1 %v510_v12  ;;  %v518_v22 = vld [vmem:[%s720_s5 + $0x20] sm:$0xff]   ;;  %v519_v23 = vld [vmem:[%s720_s5 + $0x28] sm:$0xff]   ;;  %v520_v32 = vld [vmem:[%s720_s5 + $0x30] sm:$0xff]  }
  0x19   :  { %465 = vmatprep.subr.bf16.mxu1 %v546_v1  ;;  %v381_v24 = vld [vmem:[%s717_s2] ss:$0 sm:$0xff]  ;;  %v521_v33 = vld [vmem:[%s720_s5 + $0x38] sm:$0xff]  }
  0x1a   :  { %448 = vmatpush3.bf16.msra.mxu0 %v504_v11  ;;  %v390_v34 = vld [vmem:[%s719_s4] ss:$0 sm:$0xff]  ;;  %s522_s4 = scalar_lea.vmem %s374_s1, 128 }
  0x1b   :  { %449 = vmatprep.subr.bf16.mxu0 %v546_v1  ;;  %v399_v42 = vld [vmem:[%s721_s6] ss:$0 sm:$0xff]  ;;  %p523_p0 = scmp.ne.s32.totalorder %s374_s1, %s522_s4  ;;  %p528_p2 = scmp.lt.s32.totalorder %s522_s4, %s522_s4 }
  0x1c   :  { %466 = vmatpush3.bf16.msra.mxu1 %v511_v14 }
  0x1d   :  { %467 = vmatprep.subr.bf16.mxu1 %v546_v1  ;;  %p529_p3 = por %p528_p2, %p527_p1 }
  0x1e   :  { %450 = vmatpush3.bf16.msra.mxu0 %v505_v13 }
  0x1f   :  { %475 = vmatprep.subr.bf16.mxu0 %v546_v1  ;;  %p530_p4 = pnand %p529_p3, %p523_p0 }
  0x20   :  { %468 = vmatpush3.bf16.msra.mxu1 %v512_v16 }
  0x21   :  { %452 = vmatmul.mubr.bf16.vlgmr.msra.gmra.mrb[0].mxu0 %v28_v15  ;;  %469 = vmatprep.subr.bf16.mxu1 %v546_v1 }
  0x22   :  { %491 = vmatprep.mubr.msk.bf16.mxu0 %vm547_vm0, %v546_v1  ;;  %476 = vmatpush3.bf16.msra.mxu0 %v514_v18 }
  0x23   :  { %477 = vmatprep.subr.bf16.mxu0 %v546_v1 }
  0x24   :  { %470 = vmatpush3.bf16.msra.mxu1 %v513_v17 }
  0x26   :  { %478 = vmatpush3.bf16.msra.mxu0 %v515_v19 }
  0x27   :  { %479 = vmatprep.subr.bf16.mxu0 %v546_v1 }
  0x2a   :  { %480 = vmatpush3.bf16.msra.mxu0 %v516_v20 }
  0x2b   :  { %481 = vmatprep.subr.bf16.mxu0 %v546_v1 }
  0x2e   :  { %482 = vmatpush3.bf16.msra.mxu0 %v517_v21 }
  0x2f   :  { %483 = vmatprep.subr.bf16.mxu0 %v546_v1 }
  0x32   :  { %484 = vmatpush3.bf16.msra.mxu0 %v518_v22 }
  0x33   :  { %485 = vmatprep.subr.bf16.mxu0 %v546_v1 }
  0x36   :  { %486 = vmatpush3.bf16.msra.mxu0 %v519_v23 }
  0x37   :  { %487 = vmatprep.subr.bf16.mxu0 %v546_v1 }
  0x3a   :  { %488 = vmatpush3.bf16.msra.mxu0 %v520_v32 }
  0x3b   :  { %489 = vmatprep.subr.bf16.mxu0 %v546_v1 }
  0x3e   :  { %490 = vmatpush3.bf16.msra.mxu0 %v521_v33 }
  0xf4   :  { %v134_v25 = vpop.f32.mrb[0].mxu0 }
  0xf5   :  { %v135_v26 = vadd.f32 %v381_v24, %v134_v25  ;;  %v453_v27 = vpop.f32.mrb[1].mxu0 }
  0xf6   :  { %v137_v28 = vpop.f32.mrb[2].mxu0 }
  0xf7   :  { %v140_v29 = vmax.f32 %v135_v26, 0.0  ;;  %v454_v30 = vpop.f32.mrb[3].mxu0 }
  0xf9   :  { %v141_v31 = vpack.c.bf16 %v140_v29, %v140_v29 }
  0xfb   :  { %472 = vmatmul.mubr.bf16.vlgmr.msra.gmra.mrb[0].mxu1 %v141_v31 }
 0x1ce   :  { %v247_v35 = vpop.f32.mrb[0].mxu1 }
 0x1cf   :  { %v248_v36 = vadd.f32 %v390_v34, %v247_v35  ;;  %v473_v37 = vpop.f32.mrb[1].mxu1 }
 0x1d0   :  { %v250_v38 = vpop.f32.mrb[2].mxu1 }
 0x1d1   :  { %v253_v39 = vmax.f32 %v248_v36, 0.0  ;;  %v474_v40 = vpop.f32.mrb[3].mxu1 }
 0x1d3   :  { %v254_v41 = vpack.c.bf16 %v253_v39, %v253_v39 }
 0x1d5   :  { %492 = vmatmul.mubr.bf16.vlgmr.msra.gmra.mrb[4].mxu0 %v254_v41 }
 0x2a8   :  { %v360_v43 = vpop.f32.mrb[4].mxu0 }
 0x2a9   :  { %v361_v44 = vadd.f32 %v399_v42, %v360_v43  ;;  %v493_v45 = vpop.f32.mrb[5].mxu0 }
 0x2aa   :  { %v363_v46 = vpop.f32.mrb[6].mxu0 }
 0x2ab   :  { %366 = vst [vmem:[#allocation2] sm:$0xff] %v361_v44  ;;  %v494_v47 = vpop.f32.mrb[7].mxu0 }
 0x2ac   :  { %533 = shalt.err (!%p530_p4)
}
 0x2ad   :  { %s534_s6 = scalar_lea.hbm %s722_s7, 128 }
 0x2ae   :  { %p535_p5 = scmp.ne.s32.totalorder %s722_s7, %s534_s6  ;;  %p538_p6 = scmp.lt.u32.totalorder %s534_s6, %s722_s7 }
 0x2b0   :  { %p540_p7 = pnand %p538_p6, %p535_p5 }
 0x2b2   :  { %543 = shalt.err (!%p540_p7)
}
 0x2b3   :  { %376 = dma.vmem_to_hbm [thread:$0]  %s374_s1, 128, %s722_s7, [#allocation3]  }
 0x2b4   :  { %544 = dma.done.wait [#allocation3], 128  }
 0x2b5   :  { %545 = vsyncadd [#allocation3], 4294967168 }
 0x2b6   :  { %380 = vsyncpa [#allocation3], 1 }

</bundles_post_ra>
